<compile_context>
chip_gen: v5e
topology: v5e:2x2
jax: 0.10.0
libtpu: 0.0.40
codegen_flags: <defaults>
</compile_context>

<pallas_src>
import numpy as np
import jax
import jax.numpy as jnp
from jax import lax
from jax.experimental import pallas as pl
from jax.experimental.pallas import tpu as pltpu


# --------------------------------- kernel ------------------------------------ #

def fused_cnn_kernel(x_ref, m1l_ref, m1r_ref, m2l_ref, m2r_ref,
                     w1_ref, b1_ref, w2_ref, b2_ref,
                     wf1_ref, bf1_ref, wf2_ref, bf2_ref,
                     out_ref, p1_ref, feat_ref):
    Bc = out_ref.shape[1]            # batch-chunk size (batch lives on lanes)
    OC1, N1 = p1_ref.shape           # N1 = (L/2) * Bc
    OC2 = w2_ref.shape[0]
    Lh = N1 // Bc                    # L/2
    Lf = N1 // (2 * Bc)              # L/4

    def conv3(xm, w_ref, b_ref, ml_ref, mr_ref):
        # xm: (Cin, n), column = l*Bc + b.  One packed matmul over the 3 taps:
        # stack [x(l-1) | x(l) | x(l+1)] along sublanes against a (OC, 3*Cin) weight.
        n = xm.shape[1]
        left = pltpu.roll(xm, Bc, axis=1) * ml_ref[...]        # x[l-1]; zeroed at l==0
        right = pltpu.roll(xm, n - Bc, axis=1) * mr_ref[...]   # x[l+1]; zeroed at l==L-1
        taps = jnp.concatenate([left, xm, right], axis=0)      # (3*Cin, n), 8-aligned stack
        return (jnp.dot(w_ref[...], taps, preferred_element_type=jnp.float32)
                + b_ref[...])

    def pair_max(y):
        # max(y[l], y[l+1]) valid at even l; the wrapped last Bc columns are never read.
        return jnp.maximum(y, pltpu.roll(y, y.shape[1] - Bc, axis=1))

    # conv1 -> relu -> pool1 (compaction = Lh static slice copies, no selection matmul)
    y1 = jnp.maximum(conv3(x_ref[...], w1_ref, b1_ref, m1l_ref, m1r_ref), 0.0)
    pm1 = pair_max(y1)                                          # (OC1, L*Bc)
    for j in range(Lh):
        p1_ref[:, j * Bc:(j + 1) * Bc] = pm1[:, 2 * j * Bc:2 * j * Bc + Bc]

    # conv2 -> relu -> pool2 fused with the flatten: pooled (OC2, Bc) blocks are
    # stacked along sublanes so FC1 consumes them directly (no compaction matmul,
    # no transpose; batch stays on lanes).
    y2 = jnp.maximum(conv3(p1_ref[...], w2_ref, b2_ref, m2l_ref, m2r_ref), 0.0)
    pm2 = pair_max(y2)                                          # (OC2, N1)
    for j in range(Lf):
        feat_ref[j * OC2:(j + 1) * OC2, :] = pm2[:, 2 * j * Bc:2 * j * Bc + Bc]

    # FC1 -> relu -> FC2, all batch-on-lanes; output block is (num_classes_pad, Bc).
    hidden = jnp.maximum(
        jnp.dot(wf1_ref[...], feat_ref[...], preferred_element_type=jnp.float32)
        + bf1_ref[...], 0.0)
    out_ref[...] = (jnp.dot(wf2_ref[...], hidden, preferred_element_type=jnp.float32)
                    + bf2_ref[...]).astype(out_ref.dtype)


# --------------------------------- wrapper ----------------------------------- #

def simple_cnn_forward(x, params, block_b=None):
    w1, b1, w2, b2, wf1, bf1, wf2, bf2 = params
    B, C, L = x.shape
    assert L % 4 == 0, "two MaxPool1d(2) stages assume seq_len divisible by 4"
    OC1, OC2 = w1.shape[0], w2.shape[0]
    Lh, Lf = L // 2, L // 4
    H = wf1.shape[0]                                    # 128
    NC = wf2.shape[0]
    NCP = ((NC + 127) // 128) * 128                     # padded class dim

    # Batch chunking: one grid step per chunk ("parallel" => megacore / v7x dual-TC).
    # For large batches pick Bc a multiple of 8 (ideally so L*Bc is a 128-multiple)
    # and size it against the per-generation VMEM limit; toy default = whole batch.
    Bc = B if block_b is None else block_b
    assert B % Bc == 0
    nchunks = B // Bc
    N, N1 = L * Bc, Lh * Bc
    Cp = ((C + 7) // 8) * 8                             # pad Cin so the 3-tap stack is 8-aligned

    f32 = jnp.float32
    # ---- layout plumbing (wrapper-side glue, outside the kernel hot path) ----
    # input chunks: (nchunks, Cp, L*Bc) with column = l*Bc + b (batch-minor merge)
    xm = jnp.transpose(x.astype(f32).reshape(nchunks, Bc, C, L), (0, 2, 3, 1))
    xm = jnp.pad(xm.reshape(nchunks, C, N), ((0, 0), (0, Cp - C), (0, 0)))

    # conv weights packed per tap: columns = [k=0 (left) | k=1 (center) | k=2 (right)]
    w1pad = jnp.pad(w1.astype(f32), ((0, 0), (0, Cp - C), (0, 0)))          # (OC1, Cp, 3)
    w1p = jnp.concatenate([w1pad[:, :, 0], w1pad[:, :, 1], w1pad[:, :, 2]], axis=1)
    w2p = jnp.concatenate([w2[:, :, 0], w2[:, :, 1], w2[:, :, 2]], axis=1).astype(f32)
    b1c, b2c = b1.reshape(OC1, 1).astype(f32), b2.reshape(OC2, 1).astype(f32)

    # 0/1 boundary masks for the rolled conv taps (replaces in-kernel iota+compare)
    def masks(n):
        lane = jnp.arange(n)
        return ((lane >= Bc).astype(f32).reshape(1, n),
                (lane < n - Bc).astype(f32).reshape(1, n))
    m1l, m1r = masks(N)
    m2l, m2r = masks(N1)

    # FC1 regrouped so its column index j*OC2 + o matches the sublane-stacked pooled
    # features (PyTorch flatten index is o*Lf + j); FC2 padded to NCP classes.
    wf1g = jnp.transpose(wf1.astype(f32).reshape(H, OC2, Lf), (0, 2, 1)).reshape(H, Lf * OC2)
    bf1c = bf1.reshape(H, 1).astype(f32)
    wf2p = jnp.pad(wf2.astype(f32), ((0, NCP - NC), (0, 0)))                # (NCP, H)
    bf2c = jnp.pad(bf2.astype(f32), (0, NCP - NC)).reshape(NCP, 1)

    consts = (m1l, m1r, m2l, m2r, w1p, b1c, w2p, b2c, wf1g, bf1c, wf2p, bf2c)

    def const_spec(a):
        zeros = (0,) * a.ndim
        return pl.BlockSpec(a.shape, lambda i: zeros)

    out_t = pl.pallas_call(
        fused_cnn_kernel,
        out_shape=jax.ShapeDtypeStruct((nchunks, NCP, Bc), f32),
        grid_spec=pltpu.PrefetchScalarGridSpec(
            num_scalar_prefetch=0,
            grid=(nchunks,),
            in_specs=[pl.BlockSpec((None, Cp, N), lambda i: (i, 0, 0))]
                     + [const_spec(a) for a in consts],
            out_specs=pl.BlockSpec((None, NCP, Bc), lambda i: (i, 0, 0)),
            scratch_shapes=[pltpu.VMEM((OC1, N1), f32),        # pooled conv1 activations
                            pltpu.VMEM((Lf * OC2, Bc), f32)],  # stacked pooled features
        ),
        compiler_params=pltpu.CompilerParams(
            dimension_semantics=("parallel",)),
    )(xm, *consts)

    # (nchunks, NCP, Bc) -> (B, num_classes): wrapper-side flip of the tiny logits
    return jnp.transpose(out_t, (0, 2, 1)).reshape(B, NCP)[:, :NC].astype(x.dtype)


# ------------------------------ params & reference --------------------------- #

def init_params(key, input_channels, seq_len, num_classes):
    to_linear = 32 * (seq_len // 4)

    def uni(k, shape, fan_in):
        bound = 1.0 / np.sqrt(fan_in)
        return jax.random.uniform(k, shape, jnp.float32, -bound, bound)

    ks = jax.random.split(key, 8)
    w1 = uni(ks[0], (16, input_channels, 3), input_channels * 3)
    b1 = uni(ks[1], (16,), input_channels * 3)
    w2 = uni(ks[2], (32, 16, 3), 16 * 3)
    b2 = uni(ks[3], (32,), 16 * 3)
    wf1 = uni(ks[4], (128, to_linear), to_linear)
    bf1 = uni(ks[5], (128,), to_linear)
    wf2 = uni(ks[6], (num_classes, 128), 128)
    bf2 = uni(ks[7], (num_classes,), 128)
    return (w1, b1, w2, b2, wf1, bf1, wf2, bf2)


def ref_forward(x, params):
    w1, b1, w2, b2, wf1, bf1, wf2, bf2 = params

    def conv1d(x, w, b):
        B, C, L = x.shape
        xp = jnp.pad(x, ((0, 0), (0, 0), (1, 1)))
        y = jnp.zeros((B, w.shape[0], L), jnp.float32)
        for k in range(3):
            y = y + jnp.einsum('oc,bcl->bol', w[:, :, k], xp[:, :, k:k + L])
        return y + b[None, :, None]

    def pool2(y):
        B, C, L = y.shape
        return jnp.max(y.reshape(B, C, L // 2, 2), axis=-1)

    y = pool2(jnp.maximum(conv1d(x, w1, b1), 0.0))
    y = pool2(jnp.maximum(conv1d(y, w2, b2), 0.0))
    y = y.reshape(y.shape[0], -1)
    y = jnp.maximum(y @ wf1.T + bf1, 0.0)
    return y @ wf2.T + bf2


# ----------------------------------- main ------------------------------------ #

if __name__ == "__main__":
    B, C, L, NUM_CLASSES = 2, 4, 16, 10
    key = jax.random.PRNGKey(0)
    kx, kp = jax.random.split(key)
    x = jax.random.normal(kx, (B, C, L), jnp.float32)
    params = init_params(kp, C, L, NUM_CLASSES)

    out = jax.jit(simple_cnn_forward)(x, params)
    out = jax.block_until_ready(out)

    ref = ref_forward(x, params)
    assert out.shape == (B, NUM_CLASSES)
    np.testing.assert_allclose(np.asarray(out), np.asarray(ref), rtol=1e-3, atol=1e-3)
    print("KERNEL_OK")
</pallas_src>

<mosaic_0001>
module attributes {stable_mosaic.version = 11 : i64} {
  func.func @fused_cnn_kernel(%arg0: i32, %arg1: memref<1x8x32xf32, #tpu.memory_space<vmem>>, %arg2: memref<1x32xf32, #tpu.memory_space<vmem>>, %arg3: memref<1x32xf32, #tpu.memory_space<vmem>>, %arg4: memref<1x16xf32, #tpu.memory_space<vmem>>, %arg5: memref<1x16xf32, #tpu.memory_space<vmem>>, %arg6: memref<16x24xf32, #tpu.memory_space<vmem>>, %arg7: memref<16x1xf32, #tpu.memory_space<vmem>>, %arg8: memref<32x48xf32, #tpu.memory_space<vmem>>, %arg9: memref<32x1xf32, #tpu.memory_space<vmem>>, %arg10: memref<128x128xf32, #tpu.memory_space<vmem>>, %arg11: memref<128x1xf32, #tpu.memory_space<vmem>>, %arg12: memref<128x128xf32, #tpu.memory_space<vmem>>, %arg13: memref<128x1xf32, #tpu.memory_space<vmem>>, %arg14: memref<1x128x2xf32, #tpu.memory_space<vmem>>, %arg15: memref<16x16xf32, #tpu.memory_space<vmem>>, %arg16: memref<128x2xf32, #tpu.memory_space<vmem>>) attributes {dimension_semantics = [#tpu.dimension_semantics<parallel>], iteration_bounds = array<i64: 1>, scalar_prefetch = 0 : i64, scratch_operands = 2 : i64, tpu.core_type = #tpu.core_type<tc>, window_params = [{transform_indices = @transform_0, window_bounds = array<i64: 1, 8, 32>}, {pipeline_mode = #tpu.pipeline_mode<synchronous>, transform_indices = @transform_1, window_bounds = array<i64: 1, 32>}, {pipeline_mode = #tpu.pipeline_mode<synchronous>, transform_indices = @transform_2, window_bounds = array<i64: 1, 32>}, {pipeline_mode = #tpu.pipeline_mode<synchronous>, transform_indices = @transform_3, window_bounds = array<i64: 1, 16>}, {pipeline_mode = #tpu.pipeline_mode<synchronous>, transform_indices = @transform_4, window_bounds = array<i64: 1, 16>}, {pipeline_mode = #tpu.pipeline_mode<synchronous>, transform_indices = @transform_5, window_bounds = array<i64: 16, 24>}, {pipeline_mode = #tpu.pipeline_mode<synchronous>, transform_indices = @transform_6, window_bounds = array<i64: 16, 1>}, {pipeline_mode = #tpu.pipeline_mode<synchronous>, transform_indices = @transform_7, window_bounds = array<i64: 32, 48>}, {pipeline_mode = #tpu.pipeline_mode<synchronous>, transform_indices = @transform_8, window_bounds = array<i64: 32, 1>}, {pipeline_mode = #tpu.pipeline_mode<synchronous>, transform_indices = @transform_9, window_bounds = array<i64: 128, 128>}, {pipeline_mode = #tpu.pipeline_mode<synchronous>, transform_indices = @transform_10, window_bounds = array<i64: 128, 1>}, {pipeline_mode = #tpu.pipeline_mode<synchronous>, transform_indices = @transform_11, window_bounds = array<i64: 128, 128>}, {pipeline_mode = #tpu.pipeline_mode<synchronous>, transform_indices = @transform_12, window_bounds = array<i64: 128, 1>}, {transform_indices = @transform_13, window_bounds = array<i64: 1, 128, 2>}]} {
    %c0 = arith.constant 0 : index
    %c0_0 = arith.constant 0 : index
    %c0_1 = arith.constant 0 : index
    %0 = vector.load %arg1[%c0, %c0_0, %c0_1] : memref<1x8x32xf32, #tpu.memory_space<vmem>>, vector<1x8x32xf32>
    %1 = vector.shape_cast %0 : vector<1x8x32xf32> to vector<8x32xf32>
    %c2_i32 = arith.constant 2 : i32
    %2 = tpu.dynamic_rotate %1 by %c2_i32 dim 1 : vector<8x32xf32>, i32 -> vector<8x32xf32>
    %c0_2 = arith.constant 0 : index
    %c0_3 = arith.constant 0 : index
    %3 = vector.load %arg2[%c0_2, %c0_3] : memref<1x32xf32, #tpu.memory_space<vmem>>, vector<1x32xf32>
    %4 = vector.broadcast %3 : vector<1x32xf32> to vector<8x32xf32>
    %5 = arith.mulf %2, %4 : vector<8x32xf32>
    %c30_i32 = arith.constant 30 : i32
    %6 = tpu.dynamic_rotate %1 by %c30_i32 dim 1 : vector<8x32xf32>, i32 -> vector<8x32xf32>
    %c0_4 = arith.constant 0 : index
    %c0_5 = arith.constant 0 : index
    %7 = vector.load %arg3[%c0_4, %c0_5] : memref<1x32xf32, #tpu.memory_space<vmem>>, vector<1x32xf32>
    %8 = vector.broadcast %7 : vector<1x32xf32> to vector<8x32xf32>
    %9 = arith.mulf %6, %8 : vector<8x32xf32>
    %10 = tpu.concatenate %5, %1, %9 in 0 : vector<8x32xf32>, vector<8x32xf32>, vector<8x32xf32> -> vector<24x32xf32>
    %c0_6 = arith.constant 0 : index
    %c0_7 = arith.constant 0 : index
    %11 = vector.load %arg6[%c0_6, %c0_7] : memref<16x24xf32, #tpu.memory_space<vmem>>, vector<16x24xf32>
    %cst = arith.constant dense<0.000000e+00> : vector<16x32xf32>
    %12 = tpu.matmul %11, %10, %cst {dimension_numbers = #tpu.dot_dimension_numbers<[1], [0], [0], [1], [0, 0, 1, 1], [], []>} : vector<16x24xf32>, vector<24x32xf32>, vector<16x32xf32> -> vector<16x32xf32>
    %c0_8 = arith.constant 0 : index
    %c0_9 = arith.constant 0 : index
    %13 = vector.load %arg7[%c0_8, %c0_9] : memref<16x1xf32, #tpu.memory_space<vmem>>, vector<16x1xf32>
    %14 = vector.broadcast %13 : vector<16x1xf32> to vector<16x32xf32>
    %15 = arith.addf %12, %14 : vector<16x32xf32>
    %cst_10 = arith.constant 0.000000e+00 : f32
    %16 = vector.broadcast %cst_10 : f32 to vector<16x32xf32>
    %17 = arith.maximumf %15, %16 : vector<16x32xf32>
    %c30_i32_11 = arith.constant 30 : i32
    %18 = tpu.dynamic_rotate %17 by %c30_i32_11 dim 1 : vector<16x32xf32>, i32 -> vector<16x32xf32>
    %19 = arith.maximumf %17, %18 : vector<16x32xf32>
    %20 = vector.extract_strided_slice %19 {offsets = [0, 0], sizes = [16, 2], strides = [1, 1]} : vector<16x32xf32> to vector<16x2xf32>
    %c0_12 = arith.constant 0 : index
    %c0_13 = arith.constant 0 : index
    %21 = vector.load %arg15[%c0_12, %c0_13] : memref<16x16xf32, #tpu.memory_space<vmem>>, vector<16x2xf32>
    tpu.vector_store %arg15[%c0_12, %c0_13], %20 {strides = array<i32>} : memref<16x16xf32, #tpu.memory_space<vmem>>, vector<16x2xf32>,
    %22 = vector.extract_strided_slice %19 {offsets = [0, 4], sizes = [16, 2], strides = [1, 1]} : vector<16x32xf32> to vector<16x2xf32>
    %c0_14 = arith.constant 0 : index
    %c2 = arith.constant 2 : index
    %23 = vector.load %arg15[%c0_14, %c2] : memref<16x16xf32, #tpu.memory_space<vmem>>, vector<16x2xf32>
    tpu.vector_store %arg15[%c0_14, %c2], %22 {strides = array<i32>} : memref<16x16xf32, #tpu.memory_space<vmem>>, vector<16x2xf32>,
    %24 = vector.extract_strided_slice %19 {offsets = [0, 8], sizes = [16, 2], strides = [1, 1]} : vector<16x32xf32> to vector<16x2xf32>
    %c0_15 = arith.constant 0 : index
    %c4 = arith.constant 4 : index
    %25 = vector.load %arg15[%c0_15, %c4] : memref<16x16xf32, #tpu.memory_space<vmem>>, vector<16x2xf32>
    tpu.vector_store %arg15[%c0_15, %c4], %24 {strides = array<i32>} : memref<16x16xf32, #tpu.memory_space<vmem>>, vector<16x2xf32>,
    %26 = vector.extract_strided_slice %19 {offsets = [0, 12], sizes = [16, 2], strides = [1, 1]} : vector<16x32xf32> to vector<16x2xf32>
    %c0_16 = arith.constant 0 : index
    %c6 = arith.constant 6 : index
    %27 = vector.load %arg15[%c0_16, %c6] : memref<16x16xf32, #tpu.memory_space<vmem>>, vector<16x2xf32>
    tpu.vector_store %arg15[%c0_16, %c6], %26 {strides = array<i32>} : memref<16x16xf32, #tpu.memory_space<vmem>>, vector<16x2xf32>,
    %28 = vector.extract_strided_slice %19 {offsets = [0, 16], sizes = [16, 2], strides = [1, 1]} : vector<16x32xf32> to vector<16x2xf32>
    %c0_17 = arith.constant 0 : index
    %c8 = arith.constant 8 : index
    %29 = vector.load %arg15[%c0_17, %c8] : memref<16x16xf32, #tpu.memory_space<vmem>>, vector<16x2xf32>
    tpu.vector_store %arg15[%c0_17, %c8], %28 {strides = array<i32>} : memref<16x16xf32, #tpu.memory_space<vmem>>, vector<16x2xf32>,
    %30 = vector.extract_strided_slice %19 {offsets = [0, 20], sizes = [16, 2], strides = [1, 1]} : vector<16x32xf32> to vector<16x2xf32>
    %c0_18 = arith.constant 0 : index
    %c10 = arith.constant 10 : index
    %31 = vector.load %arg15[%c0_18, %c10] : memref<16x16xf32, #tpu.memory_space<vmem>>, vector<16x2xf32>
    tpu.vector_store %arg15[%c0_18, %c10], %30 {strides = array<i32>} : memref<16x16xf32, #tpu.memory_space<vmem>>, vector<16x2xf32>,
    %32 = vector.extract_strided_slice %19 {offsets = [0, 24], sizes = [16, 2], strides = [1, 1]} : vector<16x32xf32> to vector<16x2xf32>
    %c0_19 = arith.constant 0 : index
    %c12 = arith.constant 12 : index
    %33 = vector.load %arg15[%c0_19, %c12] : memref<16x16xf32, #tpu.memory_space<vmem>>, vector<16x2xf32>
    tpu.vector_store %arg15[%c0_19, %c12], %32 {strides = array<i32>} : memref<16x16xf32, #tpu.memory_space<vmem>>, vector<16x2xf32>,
    %34 = vector.extract_strided_slice %19 {offsets = [0, 28], sizes = [16, 2], strides = [1, 1]} : vector<16x32xf32> to vector<16x2xf32>
    %c0_20 = arith.constant 0 : index
    %c14 = arith.constant 14 : index
    %35 = vector.load %arg15[%c0_20, %c14] : memref<16x16xf32, #tpu.memory_space<vmem>>, vector<16x2xf32>
    tpu.vector_store %arg15[%c0_20, %c14], %34 {strides = array<i32>} : memref<16x16xf32, #tpu.memory_space<vmem>>, vector<16x2xf32>,
    %c0_21 = arith.constant 0 : index
    %c0_22 = arith.constant 0 : index
    %36 = vector.load %arg15[%c0_21, %c0_22] : memref<16x16xf32, #tpu.memory_space<vmem>>, vector<16x16xf32>
    %c2_i32_23 = arith.constant 2 : i32
    %37 = tpu.dynamic_rotate %36 by %c2_i32_23 dim 1 : vector<16x16xf32>, i32 -> vector<16x16xf32>
    %c0_24 = arith.constant 0 : index
    %c0_25 = arith.constant 0 : index
    %38 = vector.load %arg4[%c0_24, %c0_25] : memref<1x16xf32, #tpu.memory_space<vmem>>, vector<1x16xf32>
    %39 = vector.broadcast %38 : vector<1x16xf32> to vector<16x16xf32>
    %40 = arith.mulf %37, %39 : vector<16x16xf32>
    %c14_i32 = arith.constant 14 : i32
    %41 = tpu.dynamic_rotate %36 by %c14_i32 dim 1 : vector<16x16xf32>, i32 -> vector<16x16xf32>
    %c0_26 = arith.constant 0 : index
    %c0_27 = arith.constant 0 : index
    %42 = vector.load %arg5[%c0_26, %c0_27] : memref<1x16xf32, #tpu.memory_space<vmem>>, vector<1x16xf32>
    %43 = vector.broadcast %42 : vector<1x16xf32> to vector<16x16xf32>
    %44 = arith.mulf %41, %43 : vector<16x16xf32>
    %45 = tpu.concatenate %40, %36, %44 in 0 : vector<16x16xf32>, vector<16x16xf32>, vector<16x16xf32> -> vector<48x16xf32>
    %c0_28 = arith.constant 0 : index
    %c0_29 = arith.constant 0 : index
    %46 = vector.load %arg8[%c0_28, %c0_29] : memref<32x48xf32, #tpu.memory_space<vmem>>, vector<32x48xf32>
    %cst_30 = arith.constant dense<0.000000e+00> : vector<32x16xf32>
    %47 = tpu.matmul %46, %45, %cst_30 {dimension_numbers = #tpu.dot_dimension_numbers<[1], [0], [0], [1], [0, 0, 1, 1], [], []>} : vector<32x48xf32>, vector<48x16xf32>, vector<32x16xf32> -> vector<32x16xf32>
    %c0_31 = arith.constant 0 : index
    %c0_32 = arith.constant 0 : index
    %48 = vector.load %arg9[%c0_31, %c0_32] : memref<32x1xf32, #tpu.memory_space<vmem>>, vector<32x1xf32>
    %49 = vector.broadcast %48 : vector<32x1xf32> to vector<32x16xf32>
    %50 = arith.addf %47, %49 : vector<32x16xf32>
    %cst_33 = arith.constant 0.000000e+00 : f32
    %51 = vector.broadcast %cst_33 : f32 to vector<32x16xf32>
    %52 = arith.maximumf %50, %51 : vector<32x16xf32>
    %c14_i32_34 = arith.constant 14 : i32
    %53 = tpu.dynamic_rotate %52 by %c14_i32_34 dim 1 : vector<32x16xf32>, i32 -> vector<32x16xf32>
    %54 = arith.maximumf %52, %53 : vector<32x16xf32>
    %55 = vector.extract_strided_slice %54 {offsets = [0, 0], sizes = [32, 2], strides = [1, 1]} : vector<32x16xf32> to vector<32x2xf32>
    %c0_35 = arith.constant 0 : index
    %c0_36 = arith.constant 0 : index
    %56 = vector.load %arg16[%c0_35, %c0_36] : memref<128x2xf32, #tpu.memory_space<vmem>>, vector<32x2xf32>
    tpu.vector_store %arg16[%c0_35, %c0_36], %55 {strides = array<i32>} : memref<128x2xf32, #tpu.memory_space<vmem>>, vector<32x2xf32>,
    %57 = vector.extract_strided_slice %54 {offsets = [0, 4], sizes = [32, 2], strides = [1, 1]} : vector<32x16xf32> to vector<32x2xf32>
    %c32 = arith.constant 32 : index
    %c0_37 = arith.constant 0 : index
    %58 = vector.load %arg16[%c32, %c0_37] : memref<128x2xf32, #tpu.memory_space<vmem>>, vector<32x2xf32>
    tpu.vector_store %arg16[%c32, %c0_37], %57 {strides = array<i32>} : memref<128x2xf32, #tpu.memory_space<vmem>>, vector<32x2xf32>,
    %59 = vector.extract_strided_slice %54 {offsets = [0, 8], sizes = [32, 2], strides = [1, 1]} : vector<32x16xf32> to vector<32x2xf32>
    %c64 = arith.constant 64 : index
    %c0_38 = arith.constant 0 : index
    %60 = vector.load %arg16[%c64, %c0_38] : memref<128x2xf32, #tpu.memory_space<vmem>>, vector<32x2xf32>
    tpu.vector_store %arg16[%c64, %c0_38], %59 {strides = array<i32>} : memref<128x2xf32, #tpu.memory_space<vmem>>, vector<32x2xf32>,
    %61 = vector.extract_strided_slice %54 {offsets = [0, 12], sizes = [32, 2], strides = [1, 1]} : vector<32x16xf32> to vector<32x2xf32>
    %c96 = arith.constant 96 : index
    %c0_39 = arith.constant 0 : index
    %62 = vector.load %arg16[%c96, %c0_39] : memref<128x2xf32, #tpu.memory_space<vmem>>, vector<32x2xf32>
    tpu.vector_store %arg16[%c96, %c0_39], %61 {strides = array<i32>} : memref<128x2xf32, #tpu.memory_space<vmem>>, vector<32x2xf32>,
    %c0_40 = arith.constant 0 : index
    %c0_41 = arith.constant 0 : index
    %63 = vector.load %arg10[%c0_40, %c0_41] : memref<128x128xf32, #tpu.memory_space<vmem>>, vector<128x128xf32>
    %c0_42 = arith.constant 0 : index
    %c0_43 = arith.constant 0 : index
    %64 = vector.load %arg16[%c0_42, %c0_43] : memref<128x2xf32, #tpu.memory_space<vmem>>, vector<128x2xf32>
    %cst_44 = arith.constant dense<0.000000e+00> : vector<128x2xf32>
    %65 = tpu.matmul %63, %64, %cst_44 {dimension_numbers = #tpu.dot_dimension_numbers<[1], [0], [0], [1], [0, 0, 1, 1], [], []>} : vector<128x128xf32>, vector<128x2xf32>, vector<128x2xf32> -> vector<128x2xf32>
    %c0_45 = arith.constant 0 : index
    %c0_46 = arith.constant 0 : index
    %66 = vector.load %arg11[%c0_45, %c0_46] : memref<128x1xf32, #tpu.memory_space<vmem>>, vector<128x1xf32>
    %67 = vector.broadcast %66 : vector<128x1xf32> to vector<128x2xf32>
    %68 = arith.addf %65, %67 : vector<128x2xf32>
    %cst_47 = arith.constant 0.000000e+00 : f32
    %69 = vector.broadcast %cst_47 : f32 to vector<128x2xf32>
    %70 = arith.maximumf %68, %69 : vector<128x2xf32>
    %c0_48 = arith.constant 0 : index
    %c0_49 = arith.constant 0 : index
    %71 = vector.load %arg12[%c0_48, %c0_49] : memref<128x128xf32, #tpu.memory_space<vmem>>, vector<128x128xf32>
    %cst_50 = arith.constant dense<0.000000e+00> : vector<128x2xf32>
    %72 = tpu.matmul %71, %70, %cst_50 {dimension_numbers = #tpu.dot_dimension_numbers<[1], [0], [0], [1], [0, 0, 1, 1], [], []>} : vector<128x128xf32>, vector<128x2xf32>, vector<128x2xf32> -> vector<128x2xf32>
    %c0_51 = arith.constant 0 : index
    %c0_52 = arith.constant 0 : index
    %73 = vector.load %arg13[%c0_51, %c0_52] : memref<128x1xf32, #tpu.memory_space<vmem>>, vector<128x1xf32>
    %74 = vector.broadcast %73 : vector<128x1xf32> to vector<128x2xf32>
    %75 = arith.addf %72, %74 : vector<128x2xf32>
    %c0_53 = arith.constant 0 : index
    %c0_54 = arith.constant 0 : index
    %c0_55 = arith.constant 0 : index
    %76 = vector.load %arg14[%c0_53, %c0_54, %c0_55] : memref<1x128x2xf32, #tpu.memory_space<vmem>>, vector<1x128x2xf32>
    %77 = vector.shape_cast %76 : vector<1x128x2xf32> to vector<128x2xf32>
    %78 = vector.shape_cast %75 : vector<128x2xf32> to vector<1x128x2xf32>
    tpu.vector_store %arg14[%c0_53, %c0_54, %c0_55], %78 {strides = array<i32>} : memref<1x128x2xf32, #tpu.memory_space<vmem>>, vector<1x128x2xf32>,
    return
  }
  func.func @transform_0(%arg0: i32) -> (i32, i32, i32) {
    %c0_i32 = arith.constant 0 : i32
    %c0_i32_0 = arith.constant 0 : i32
    %c0_i32_1 = arith.constant 0 : i32
    return %arg0, %c0_i32, %c0_i32_0 : i32, i32, i32
  }
  func.func @transform_1(%arg0: i32) -> (i32, i32) {
    %c0_i32 = arith.constant 0 : i32
    %c0_i32_0 = arith.constant 0 : i32
    %c0_i32_1 = arith.constant 0 : i32
    return %c0_i32, %c0_i32_0 : i32, i32
  }
  func.func @transform_2(%arg0: i32) -> (i32, i32) {
    %c0_i32 = arith.constant 0 : i32
    %c0_i32_0 = arith.constant 0 : i32
    %c0_i32_1 = arith.constant 0 : i32
    return %c0_i32, %c0_i32_0 : i32, i32
  }
  func.func @transform_3(%arg0: i32) -> (i32, i32) {
    %c0_i32 = arith.constant 0 : i32
    %c0_i32_0 = arith.constant 0 : i32
    %c0_i32_1 = arith.constant 0 : i32
    return %c0_i32, %c0_i32_0 : i32, i32
  }
  func.func @transform_4(%arg0: i32) -> (i32, i32) {
    %c0_i32 = arith.constant 0 : i32
    %c0_i32_0 = arith.constant 0 : i32
    %c0_i32_1 = arith.constant 0 : i32
    return %c0_i32, %c0_i32_0 : i32, i32
  }
  func.func @transform_5(%arg0: i32) -> (i32, i32) {
    %c0_i32 = arith.constant 0 : i32
    %c0_i32_0 = arith.constant 0 : i32
    %c0_i32_1 = arith.constant 0 : i32
    return %c0_i32, %c0_i32_0 : i32, i32
  }
  func.func @transform_6(%arg0: i32) -> (i32, i32) {
    %c0_i32 = arith.constant 0 : i32
    %c0_i32_0 = arith.constant 0 : i32
    %c0_i32_1 = arith.constant 0 : i32
    return %c0_i32, %c0_i32_0 : i32, i32
  }
  func.func @transform_7(%arg0: i32) -> (i32, i32) {
    %c0_i32 = arith.constant 0 : i32
    %c0_i32_0 = arith.constant 0 : i32
    %c0_i32_1 = arith.constant 0 : i32
    return %c0_i32, %c0_i32_0 : i32, i32
  }
  func.func @transform_8(%arg0: i32) -> (i32, i32) {
    %c0_i32 = arith.constant 0 : i32
    %c0_i32_0 = arith.constant 0 : i32
    %c0_i32_1 = arith.constant 0 : i32
    return %c0_i32, %c0_i32_0 : i32, i32
  }
  func.func @transform_9(%arg0: i32) -> (i32, i32) {
    %c0_i32 = arith.constant 0 : i32
    %c0_i32_0 = arith.constant 0 : i32
    %c0_i32_1 = arith.constant 0 : i32
    return %c0_i32, %c0_i32_0 : i32, i32
  }
  func.func @transform_10(%arg0: i32) -> (i32, i32) {
    %c0_i32 = arith.constant 0 : i32
    %c0_i32_0 = arith.constant 0 : i32
    %c0_i32_1 = arith.constant 0 : i32
    return %c0_i32, %c0_i32_0 : i32, i32
  }
  func.func @transform_11(%arg0: i32) -> (i32, i32) {
    %c0_i32 = arith.constant 0 : i32
    %c0_i32_0 = arith.constant 0 : i32
    %c0_i32_1 = arith.constant 0 : i32
    return %c0_i32, %c0_i32_0 : i32, i32
  }
  func.func @transform_12(%arg0: i32) -> (i32, i32) {
    %c0_i32 = arith.constant 0 : i32
    %c0_i32_0 = arith.constant 0 : i32
    %c0_i32_1 = arith.constant 0 : i32
    return %c0_i32, %c0_i32_0 : i32, i32
  }
  func.func @transform_13(%arg0: i32) -> (i32, i32, i32) {
    %c0_i32 = arith.constant 0 : i32
    %c0_i32_0 = arith.constant 0 : i32
    %c0_i32_1 = arith.constant 0 : i32
    return %arg0, %c0_i32, %c0_i32_0 : i32, i32, i32
  }
}

</mosaic_0001>

<bundles_post_ra>
// kernel: simple_cnn_forward.1
= control target key start
LH: loop header
LB: loop body
LE: loop exit
PB: predicated region body
PF: predicated region fallthrough
CT: control target
= control target key end

     0   :  { %s952_s27 = smov 32   ;;  %s953_s15 = smov 2   ;;  %vm45_vm0 = vcmask 1047808   ;;  %v957_v16 = vmov 0   ;;  %vm96_vm1 = vcmask 195584   ;;  %vm150_vm2 = vcmask 15360   ;;  %s1451_s0 = inlined_call_operand.vmem [shape: f32[1,8,32], index: 0, kind: input, shape index: {}]   ;;  %s1452_s2 = inlined_call_operand.vmem [shape: f32[1,32], index: 2, kind: input, shape index: {}]   ;;  %s1453_s1 = inlined_call_operand.vmem [shape: f32[1,32], index: 1, kind: input, shape index: {}]   ;;  %s1454_s6 = inlined_call_operand.vmem [shape: f32[16,1], index: 6, kind: input, shape index: {}]   ;;  %s1455_s5 = inlined_call_operand.vmem [shape: f32[16,24], index: 5, kind: input, shape index: {}]   ;;  %s1456_s4 = inlined_call_operand.vmem [shape: f32[1,16], index: 4, kind: input, shape index: {}]   ;;  %s1457_s3 = inlined_call_operand.vmem [shape: f32[1,16], index: 3, kind: input, shape index: {}]   ;;  %s1458_s8 = inlined_call_operand.vmem [shape: f32[32,1], index: 8, kind: input, shape index: {}]   ;;  %s1459_s7 = inlined_call_operand.vmem [shape: f32[32,48], index: 7, kind: input, shape index: {}]   ;;  %s1460_s10 = inlined_call_operand.vmem [shape: f32[128,1], index: 10, kind: input, shape index: {}]   ;;  %s1461_s12 = inlined_call_operand.vmem [shape: f32[128,1], index: 12, kind: input, shape index: {}]   ;;  %s1462_s9 = inlined_call_operand.vmem [shape: f32[128,128], index: 9, kind: input, shape index: {}]   ;;  %s1463_s11 = inlined_call_operand.vmem [shape: f32[128,128], index: 11, kind: input, shape index: {}]   ;;  %s1464_s13 = inlined_call_operand.vmem [shape: f32[1,128,2], index: 13, kind: output, shape index: {}]  }
   0x1   :  { %v44_v0 = vld [vmem:[%s1451_s0] sm:$0xff]  ;;  %s954_s16 = smov 30   ;;  %s955_s0 = smov 28   ;;  %v75_v15 = vld [vmem:[%s1454_s6 + $0x8] sm:$0xff]  ;;  %921 = vset.pattern.permute.xlu0 %v957_v16  ;;  %920 = vset.pattern.permute.xlu2 %v957_v16  ;;  %vm161_vm3 = vcmask 31760   ;;  %vm170_vm4 = vcmask 48160  }
   0x2   :  { %46 = vrot.lane.b32.xlu0 %v44_v0, %s952_s27  ;;  %v948_v1 = vld [vmem:[%s1452_s2] ss:$0 sm:$0xff]  ;;  %947 = vset.pattern.permute.xlu1 %v957_v16  ;;  %v73_v22 = vld [vmem:[%s1455_s5 + $0x8] sm:$0xff]  ;;  %s959_s23 = smov 122   ;;  %s960_s24 = smov 124   ;;  %vm179_vm5 = vcmask 64560  }
   0x3   :  { %v949_v2 = vld [vmem:[%s1453_s1] ss:$0 sm:$0xff]  ;;  %62 = vrot.lane.b32.xlu1 %v948_v1, %s953_s15  ;;  %s956_s1 = smov 98   ;;  %s961_s25 = smov 118   ;;  %vm188_vm6 = vcmask 80960   ;;  %vm197_vm7 = vcmask 97360  }
   0x4   :  { %55 = vrot.lane.b32.xlu2 %v949_v2, %s954_s16  ;;  %v74_v14 = vld [vmem:[%s1454_s6] sm:$0xff]  ;;  %s962_s26 = smov 120   ;;  %s964_s28 = smov 116   ;;  %vm206_vm8 = vcmask 113760   ;;  %vm215_vm9 = vcmask 130160   ;;  %vm220_vm10 = vcmask 1047680  }
   0x5   :  { %v72_v20 = vld [vmem:[%s1455_s5] sm:$0xff]  ;;  %s958_s5 = smov 126   ;;  %s965_s29 = smov 16   ;;  %vm309_vm11 = vcmask 392192  }
   0x6   :  { %v950_v58 = vld [vmem:[%s1456_s4] ss:$0 sm:$0xff] }
   0x7   :  { %v951_v63 = vld [vmem:[%s1457_s3] ss:$0 sm:$0xff]  ;;  %s967_s3 = smov 12  }
   0xc   :  { %67 = vrot.lane.b32.xlu2 %v44_v0, %s954_s16  ;;  %s966_s16 = smov 14  }
  0x14   :  { %83 = vperm.xlu2 %920, %v75_v15   ;;  %v266_v15 = vld [vmem:[%s1458_s8 + $0x8] sm:$0xff] }
  0x5e   :  { %v56_v9 = vpop.permute.xlu2 %55 }
  0x66   :  { %v68_v11 = vpop.permute.xlu2 %67 }
  0x6e   :  { %v84_v27 = vpop.permute.xlu2 %83 }
  0x74   :  { %v47_v3 = vpop.permute.xlu0 %46 }
  0x75   :  { %v48_v4 = vsel %vm45_vm0, %v47_v3, %v44_v0  ;;  %v63_v5 = vpop.permute.xlu1 %62 }
  0x76   :  { %49 = vrot.lane.b32.xlu0 %v48_v4, %s952_s27 }
  0xe8   :  { %v50_v6 = vpop.permute.xlu0 %49 }
  0xe9   :  { %v51_v7 = vsel %vm45_vm0, %v50_v6, %v44_v0 }
  0xea   :  { %v65_v8 = vmul.f32 %v63_v5, %v51_v7  ;;  %v58_v10 = vmul.f32 %v56_v9, %v51_v7 }
  0xec   :  { %70 = vrot.lane.b32.xlu1 %v65_v8, %s955_s0 }
  0xf4   :  { %87 = vrot.lane.b32.xlu1 %v58_v10, %s956_s1 }
 0x15e   :  { %v71_v12 = vpop.permute.xlu1 %70 }
 0x15f   :  { %v915_v13 = vpack.i.bf16 %v68_v11, %v71_v12 }
 0x161   :  { %916 = vrot.lane.b32.xlu0 %v915_v13, %s956_s1 }
 0x166   :  { %v88_v21 = vpop.permute.xlu1 %87 }
 0x169   :  { %78 = vperm.xlu0 %921, %v74_v14  }
 0x1d3   :  { %v917_v17 = vpop.permute.xlu0 %916 }
 0x1d4   :  { %v918_v18 = vunpack.i.l.bf16 %v917_v17  ;;  %v919_v19 = vunpack.i.h.bf16 %v917_v17  ;;  %v268_v17 = vld [vmem:[%s1458_s8 + $0x18] sm:$0xff] }
 0x1d6   :  { %116 = vmatpush.msra.mxu0 %v918_v18  ;;  %v265_v18 = vld [vmem:[%s1458_s8] sm:$0xff] }
 0x1d8   :  { %117 = vmatpush.msra.mxu0 %v919_v19 }
 0x1da   :  { %118 = vmatpush.msra.mxu0 %v88_v21 }
 0x1db   :  { %861 = vmatmul.msk.f32.vlgmr.msra.gmra.mxu0 %vm96_vm1, %v72_v20  ;;  %v79_v23 = vpop.permute.xlu0 %78 }
 0x1e3   :  { %862 = vmatmul.msk.f32.gmra.mxu0 %vm96_vm1, %v73_v22 }
 0x258   :  { %v120_v24 = vpop.f32.mrf.mxu0 }
 0x259   :  { %v121_v25 = vadd.f32 %v120_v24, %v79_v23 }
 0x25b   :  { %v126_v26 = vmax.f32 %v121_v25, 0.0  ;;  %v267_v25 = vld [vmem:[%s1458_s8 + $0x10] sm:$0xff] }
 0x25d   :  { %128 = vrot.lane.b32.xlu2 %v126_v26, %s952_s27 }
 0x260   :  { %v123_v28 = vpop.f32.mrf.mxu0 }
 0x261   :  { %v124_v29 = vadd.f32 %v123_v28, %v84_v27 }
 0x263   :  { %v127_v30 = vmax.f32 %v124_v29, 0.0  ;;  %v261_v29 = vld [vmem:[%s1459_s7] sm:$0xff] }
 0x265   :  { %131 = vrot.lane.b32.xlu1 %v127_v30, %s952_s27 }
 0x2b7   :  { %v129_v31 = vpop.permute.xlu2 %128 }
 0x2b8   :  { %v130_v32 = vsel %vm45_vm0, %v129_v31, %v126_v26  ;;  %v263_v31 = vld [vmem:[%s1459_s7 + $0x10] sm:$0xff] }
 0x2b9   :  { %134 = vrot.lane.b32.xlu2 %v130_v32, %s952_s27  ;;  %v264_v32 = vld [vmem:[%s1459_s7 + $0x18] sm:$0xff] }
 0x2d7   :  { %v132_v33 = vpop.permute.xlu1 %131 }
 0x2d8   :  { %v133_v34 = vsel %vm45_vm0, %v132_v33, %v127_v30 }
 0x2d9   :  { %136 = vrot.lane.b32.xlu1 %v133_v34, %s952_s27  ;;  %s963_s27 = smov 114  }
 0x313   :  { %v135_v35 = vpop.permute.xlu2 %134 }
 0x314   :  { %v138_v36 = vsel %vm45_vm0, %v135_v35, %v126_v26 }
 0x315   :  { %142 = vrot.lane.b32.xlu1 %v138_v36, %s958_s5 }
 0x34b   :  { %v137_v37 = vpop.permute.xlu1 %136 }
 0x34c   :  { %v139_v38 = vsel %vm45_vm0, %v137_v37, %v127_v30 }
 0x34d   :  { %144 = vrot.lane.b32.xlu0 %v139_v38, %s958_s5 }
 0x387   :  { %v143_v39 = vpop.permute.xlu1 %142 }
 0x388   :  { %v148_v40 = vmax.f32 %v126_v26, %v143_v39 }
 0x38a   :  { %173 = vrot.lane.b32.xlu2 %v148_v40, %s959_s23  ;;  %164 = vrot.lane.b32.xlu0 %v148_v40, %s960_s24  ;;  %151 = vst.msk [vmem:[#allocation2] sm:$0xff] %vm150_vm2, %v148_v40 }
 0x38b   :  { %155 = vrot.lane.b32.xlu1 %v148_v40, %s958_s5 }
 0x392   :  { %191 = vrot.lane.b32.xlu0 %v148_v40, %s961_s25 }
 0x393   :  { %182 = vrot.lane.b32.xlu1 %v148_v40, %s962_s26 }
 0x3bf   :  { %v145_v41 = vpop.permute.xlu0 %144 }
 0x3c0   :  { %v149_v42 = vmax.f32 %v127_v30, %v145_v41  ;;  %v262_v30 = vld [vmem:[%s1459_s7 + $0x8] sm:$0xff] }
 0x3c2   :  { %157 = vrot.lane.b32.xlu2 %v149_v42, %s958_s5  ;;  %166 = vrot.lane.b32.xlu0 %v149_v42, %s960_s24  ;;  %152 = vst.msk [vmem:[#allocation2 + $0x8] sm:$0xff] %vm150_vm2, %v149_v42 }
 0x3c3   :  { %184 = vrot.lane.b32.xlu1 %v149_v42, %s962_s26 }
 0x3ca   :  { %175 = vrot.lane.b32.xlu2 %v149_v42, %s959_s23  ;;  %193 = vrot.lane.b32.xlu0 %v149_v42, %s961_s25 }
 0x3cb   :  { %211 = vrot.lane.b32.xlu1 %v149_v42, %s963_s27 }
 0x3d2   :  { %202 = vrot.lane.b32.xlu2 %v149_v42, %s964_s28  ;;  %209 = vrot.lane.b32.xlu0 %v148_v40, %s963_s27 }
 0x3da   :  { %200 = vrot.lane.b32.xlu2 %v148_v40, %s964_s28 }
 0x3e4   :  { %v174_v45 = vpop.permute.xlu2 %173 }
 0x3fc   :  { %v165_v43 = vpop.permute.xlu0 %164 }
 0x3fd   :  { %v156_v44 = vpop.permute.xlu1 %155 }
 0x3fe   :  { %162 = vst.msk [vmem:[#allocation2] sm:$0xff] %vm161_vm3, %v156_v44 }
 0x3ff   :  { %171 = vst.msk [vmem:[#allocation2] sm:$0xff] %vm170_vm4, %v165_v43 }
 0x400   :  { %180 = vst.msk [vmem:[#allocation2] sm:$0xff] %vm179_vm5, %v174_v45 }
 0x404   :  { %v192_v46 = vpop.permute.xlu0 %191 }
 0x405   :  { %v183_v47 = vpop.permute.xlu1 %182 }
 0x406   :  { %189 = vst.msk [vmem:[#allocation2] sm:$0xff] %vm188_vm6, %v183_v47 }
 0x407   :  { %198 = vst.msk [vmem:[#allocation2] sm:$0xff] %vm197_vm7, %v192_v46 }
 0x41c   :  { %v158_v48 = vpop.permute.xlu2 %157 }
 0x41d   :  { %163 = vst.msk [vmem:[#allocation2 + $0x8] sm:$0xff] %vm161_vm3, %v158_v48 }
 0x424   :  { %v176_v49 = vpop.permute.xlu2 %175 }
 0x42c   :  { %v203_v50 = vpop.permute.xlu2 %202 }
 0x434   :  { %v201_v51 = vpop.permute.xlu2 %200  ;;  %v167_v52 = vpop.permute.xlu0 %166 }
 0x435   :  { %207 = vst.msk [vmem:[#allocation2] sm:$0xff] %vm206_vm8, %v201_v51  ;;  %v185_v53 = vpop.permute.xlu1 %184 }
 0x436   :  { %172 = vst.msk [vmem:[#allocation2 + $0x8] sm:$0xff] %vm170_vm4, %v167_v52 }
 0x437   :  { %181 = vst.msk [vmem:[#allocation2 + $0x8] sm:$0xff] %vm179_vm5, %v176_v49 }
 0x438   :  { %190 = vst.msk [vmem:[#allocation2 + $0x8] sm:$0xff] %vm188_vm6, %v185_v53 }
 0x43c   :  { %v194_v54 = vpop.permute.xlu0 %193 }
 0x43d   :  { %199 = vst.msk [vmem:[#allocation2 + $0x8] sm:$0xff] %vm197_vm7, %v194_v54  ;;  %v212_v55 = vpop.permute.xlu1 %211 }
 0x43e   :  { %208 = vst.msk [vmem:[#allocation2 + $0x8] sm:$0xff] %vm206_vm8, %v203_v50 }
 0x43f   :  { %217 = vst.msk [vmem:[#allocation2 + $0x8] sm:$0xff] %vm215_vm9, %v212_v55 }
 0x444   :  { %v210_v56 = vpop.permute.xlu0 %209 }
 0x445   :  { %216 = vst.msk [vmem:[#allocation2] sm:$0xff] %vm215_vm9, %v210_v56 }
 0x446   :  { %v219_v57 = vld [vmem:[#allocation2 + $0x8] sm:$0xff] }
 0x447   :  { %224 = vrot.lane.b32.xlu1 %v219_v57, %s965_s29 }
 0x44c   :  { %v218_v59 = vld [vmem:[#allocation2] sm:$0xff] }
 0x44d   :  { %221 = vrot.lane.b32.xlu2 %v218_v59, %s965_s29  ;;  %v927_v60 = vpack.i.bf16 %v218_v59, %v219_v57 }
 0x44f   :  { %244 = vrot.lane.b32.xlu1 %v950_v58, %s953_s15 }
 0x457   :  { %928 = vrot.lane.b32.xlu1 %v927_v60, %s966_s16 }
 0x4a7   :  { %v222_v61 = vpop.permute.xlu2 %221 }
 0x4a8   :  { %v223_v62 = vsel %vm220_vm10, %v222_v61, %v218_v59 }
 0x4a9   :  { %227 = vrot.lane.b32.xlu2 %v223_v62, %s965_s29 }
 0x4b1   :  { %236 = vrot.lane.b32.xlu2 %v951_v63, %s966_s16 }
 0x4b9   :  { %v225_v0 = vpop.permute.xlu1 %224 }
 0x4ba   :  { %v226_v1 = vsel %vm220_vm10, %v225_v0, %v219_v57 }
 0x4bb   :  { %229 = vrot.lane.b32.xlu0 %v226_v1, %s965_s29 }
 0x4c1   :  { %v245_v2 = vpop.permute.xlu1 %244 }
 0x4c9   :  { %v929_v3 = vpop.permute.xlu1 %928 }
 0x4ca   :  { %938 = vrot.lane.b32.xlu1 %v929_v3, %s963_s27 }
 0x4d2   :  { %281 = vperm.xlu1 %947, %v267_v25   ;;  %v684_v25 = vld [vmem:[%s1461_s12 + $0x20] sm:$0xff] }
 0x503   :  { %v228_v4 = vpop.permute.xlu2 %227 }
 0x504   :  { %v231_v5 = vsel %vm220_vm10, %v228_v4, %v218_v59 }
 0x505   :  { %v247_v9 = vmul.f32 %v245_v2, %v231_v5 }
 0x50b   :  { %v237_v6 = vpop.permute.xlu2 %236 }
 0x50c   :  { %v239_v10 = vmul.f32 %v237_v6, %v231_v5 }
 0x52d   :  { %v230_v7 = vpop.permute.xlu0 %229 }
 0x52e   :  { %v232_v8 = vsel %vm220_vm10, %v230_v7, %v219_v57 }
 0x52f   :  { %v240_v11 = vmul.f32 %v237_v6, %v232_v8  ;;  %v248_v12 = vmul.f32 %v245_v2, %v232_v8 }
 0x531   :  { %v922_v13 = vpack.i.bf16 %v247_v9, %v248_v12  ;;  %v942_v14 = vpack.i.bf16 %v239_v10, %v240_v11  ;;  %v500_v9 = vld [vmem:[%s1460_s10 + $0x68] sm:$0xff]  ;;  %v497_v10 = vld [vmem:[%s1460_s10 + $0x50] sm:$0xff]  ;;  %v502_v12 = vld [vmem:[%s1460_s10 + $0x78] sm:$0xff] }
 0x532   :  { %v501_v11 = vld [vmem:[%s1460_s10 + $0x70] sm:$0xff] }
 0x533   :  { %923 = vrot.lane.b32.xlu0 %v922_v13, %s967_s3  ;;  %943 = vrot.lane.b32.xlu2 %v942_v14, %s963_s27  ;;  %v494_v13 = vld [vmem:[%s1460_s10 + $0x38] sm:$0xff] }
 0x534   :  { %v498_v14 = vld [vmem:[%s1460_s10 + $0x58] sm:$0xff] }
 0x53b   :  { %276 = vperm.xlu2 %920, %v266_v15   ;;  %v499_v15 = vld [vmem:[%s1460_s10 + $0x60] sm:$0xff] }
 0x53c   :  { %v939_v21 = vpop.permute.xlu1 %938 }
 0x53d   :  { %v940_v23 = vunpack.i.l.bf16 %v939_v21  ;;  %v941_v26 = vunpack.i.h.bf16 %v939_v21  ;;  %v493_v21 = vld [vmem:[%s1460_s10 + $0x30] sm:$0xff] }
 0x544   :  { %v282_v38 = vpop.permute.xlu1 %281 }
 0x58d   :  { %v944_v24 = vpop.permute.xlu2 %943 }
 0x58e   :  { %v945_v27 = vunpack.i.l.bf16 %v944_v24  ;;  %v946_v28 = vunpack.i.h.bf16 %v944_v24  ;;  %v490_v24 = vld [vmem:[%s1460_s10 + $0x18] sm:$0xff] }
 0x595   :  { %v277_v34 = vpop.permute.xlu2 %276 }
 0x5a5   :  { %v924_v16 = vpop.permute.xlu0 %923 }
 0x5a6   :  { %933 = vrot.lane.b32.xlu0 %v924_v16, %s963_s27  ;;  %v491_v16 = vld [vmem:[%s1460_s10 + $0x20] sm:$0xff] }
 0x5ae   :  { %286 = vperm.xlu0 %921, %v268_v17   ;;  %v495_v17 = vld [vmem:[%s1460_s10 + $0x40] sm:$0xff] }
 0x5b6   :  { %271 = vperm.xlu0 %921, %v265_v18   ;;  %v496_v18 = vld [vmem:[%s1460_s10 + $0x48] sm:$0xff] }
 0x618   :  { %v934_v19 = vpop.permute.xlu0 %933 }
 0x619   :  { %v935_v20 = vunpack.i.l.bf16 %v934_v19  ;;  %v936_v22 = vunpack.i.h.bf16 %v934_v19  ;;  %v488_v19 = vld [vmem:[%s1460_s10 + $0x8] sm:$0xff] }
 0x61b   :  { %332 = vmatpush.msra.mxu1 %v935_v20  ;;  %v492_v20 = vld [vmem:[%s1460_s10 + $0x28] sm:$0xff] }
 0x61d   :  { %333 = vmatpush.msra.mxu1 %v936_v22  ;;  %v681_v22 = vld [vmem:[%s1461_s12 + $0x8] sm:$0xff] }
 0x61f   :  { %334 = vmatpush.msra.mxu1 %v940_v23  ;;  %v489_v23 = vld [vmem:[%s1460_s10 + $0x10] sm:$0xff] }
 0x620   :  { %v287_v42 = vpop.permute.xlu0 %286 }
 0x621   :  { %335 = vmatpush.msra.mxu1 %v941_v26  ;;  %v680_v26 = vld [vmem:[%s1461_s12] sm:$0xff] }
 0x623   :  { %336 = vmatpush.msra.mxu1 %v945_v27  ;;  %v487_v27 = vld [vmem:[%s1460_s10] sm:$0xff] }
 0x625   :  { %337 = vmatpush.msra.mxu1 %v946_v28  ;;  %v687_v28 = vld [vmem:[%s1461_s12 + $0x38] sm:$0xff] }
 0x626   :  { %863 = vmatmul.msk.f32.vlgmr.msra.gmra.mxu1 %vm309_vm11, %v261_v29  ;;  %v683_v29 = vld [vmem:[%s1461_s12 + $0x18] sm:$0xff] }
 0x628   :  { %v272_v46 = vpop.permute.xlu0 %271 }
 0x62e   :  { %864 = vmatmul.msk.f32.gmra.mxu1 %vm309_vm11, %v262_v30  ;;  %v682_v30 = vld [vmem:[%s1461_s12 + $0x10] sm:$0xff] }
 0x636   :  { %865 = vmatmul.msk.f32.gmra.mxu1 %vm309_vm11, %v263_v31  ;;  %v690_v31 = vld [vmem:[%s1461_s12 + $0x50] sm:$0xff] }
 0x63e   :  { %866 = vmatmul.msk.f32.gmra.mxu1 %vm309_vm11, %v264_v32  ;;  %v686_v32 = vld [vmem:[%s1461_s12 + $0x30] sm:$0xff] }
 0x6a3   :  { %v339_v33 = vpop.f32.mrf.mxu1 }
 0x6a4   :  { %v340_v47 = vadd.f32 %v339_v33, %v272_v46  ;;  %v694_v46 = vld [vmem:[%s1461_s12 + $0x70] sm:$0xff] }
 0x6a6   :  { %v351_v48 = vmax.f32 %v340_v47, 0.0 }
 0x6ab   :  { %v342_v35 = vpop.f32.mrf.mxu1 }
 0x6ac   :  { %v343_v36 = vadd.f32 %v342_v35, %v277_v34  ;;  %v685_v34 = vld [vmem:[%s1461_s12 + $0x28] sm:$0xff] }
 0x6ad   :  { %v693_v35 = vld [vmem:[%s1461_s12 + $0x68] sm:$0xff] }
 0x6ae   :  { %v352_v37 = vmax.f32 %v343_v36, 0.0  ;;  %v689_v36 = vld [vmem:[%s1461_s12 + $0x48] sm:$0xff] }
 0x6b0   :  { %358 = vrot.lane.b32.xlu0 %v352_v37, %s965_s29 }
 0x6b3   :  { %v345_v39 = vpop.f32.mrf.mxu1 }
 0x6b4   :  { %v346_v40 = vadd.f32 %v345_v39, %v282_v38  ;;  %v688_v38 = vld [vmem:[%s1461_s12 + $0x40] sm:$0xff] }
 0x6b5   :  { %v692_v39 = vld [vmem:[%s1461_s12 + $0x60] sm:$0xff] }
 0x6b6   :  { %v353_v41 = vmax.f32 %v346_v40, 0.0 }
 0x6b8   :  { %361 = vrot.lane.b32.xlu2 %v353_v41, %s965_s29 }
 0x6bb   :  { %v348_v43 = vpop.f32.mrf.mxu1 }
 0x6bc   :  { %v349_v44 = vadd.f32 %v348_v43, %v287_v42  ;;  %v691_v42 = vld [vmem:[%s1461_s12 + $0x58] sm:$0xff] }
 0x6bd   :  { %v695_v43 = vld [vmem:[%s1461_s12 + $0x78] sm:$0xff] }
 0x6be   :  { %v354_v45 = vmax.f32 %v349_v44, 0.0 }
 0x6c0   :  { %364 = vrot.lane.b32.xlu1 %v354_v45, %s965_s29 }
 0x6c8   :  { %355 = vrot.lane.b32.xlu1 %v351_v48, %s965_s29 }
 0x712   :  { %v362_v49 = vpop.permute.xlu2 %361 }
 0x713   :  { %v363_v50 = vsel %vm220_vm10, %v362_v49, %v353_v41 }
 0x714   :  { %371 = vrot.lane.b32.xlu0 %v363_v50, %s965_s29 }
 0x722   :  { %v359_v51 = vpop.permute.xlu0 %358 }
 0x723   :  { %v360_v52 = vsel %vm220_vm10, %v359_v51, %v352_v37 }
 0x724   :  { %369 = vrot.lane.b32.xlu1 %v360_v52, %s965_s29 }
 0x732   :  { %v365_v53 = vpop.permute.xlu1 %364 }
 0x733   :  { %v366_v54 = vsel %vm220_vm10, %v365_v53, %v354_v45 }
 0x734   :  { %373 = vrot.lane.b32.xlu2 %v366_v54, %s965_s29 }
 0x73a   :  { %v356_v55 = vpop.permute.xlu1 %355 }
 0x73b   :  { %v357_v56 = vsel %vm220_vm10, %v356_v55, %v351_v48 }
 0x73c   :  { %367 = vrot.lane.b32.xlu2 %v357_v56, %s965_s29 }
 0x786   :  { %v372_v57 = vpop.permute.xlu0 %371 }
 0x787   :  { %v377_v58 = vsel %vm220_vm10, %v372_v57, %v353_v41 }
 0x788   :  { %387 = vrot.lane.b32.xlu1 %v377_v58, %s958_s5 }
 0x78e   :  { %v374_v59 = vpop.permute.xlu2 %373 }
 0x78f   :  { %v378_v60 = vsel %vm220_vm10, %v374_v59, %v354_v45 }
 0x790   :  { %389 = vrot.lane.b32.xlu0 %v378_v60, %s958_s5 }
 0x796   :  { %v368_v61 = vpop.permute.xlu2 %367  ;;  %v370_v62 = vpop.permute.xlu1 %369 }
 0x797   :  { %v375_v63 = vsel %vm220_vm10, %v368_v61, %v351_v48  ;;  %v376_v0 = vsel %vm220_vm10, %v370_v62, %v352_v37 }
 0x798   :  { %383 = vrot.lane.b32.xlu0 %v375_v63, %s958_s5  ;;  %385 = vrot.lane.b32.xlu2 %v376_v0, %s958_s5 }
 0x7f2   :  { %v386_v1 = vpop.permute.xlu2 %385 }
 0x7f3   :  { %v396_v2 = vmax.f32 %v352_v37, %v386_v1 }
 0x7f5   :  { %400 = vst.msk [vmem:[#allocation3 + $0x8] sm:$0xff] %vm150_vm2, %v396_v2  ;;  %441 = vrot.lane.b32.xlu0 %v396_v2, %s964_s28 }
 0x7fa   :  { %v388_v3 = vpop.permute.xlu1 %387 }
 0x7fb   :  { %v397_v4 = vmax.f32 %v353_v41, %v388_v3 }
 0x7fc   :  { %v472_v3 = vld [vmem:[#allocation3 + $0x8] sm:$0xff] }
 0x7fd   :  { %401 = vst.msk [vmem:[#allocation3 + $0x10] sm:$0xff] %vm150_vm2, %v397_v4  ;;  %427 = vrot.lane.b32.xlu0 %v397_v4, %s962_s26  ;;  %443 = vrot.lane.b32.xlu2 %v397_v4, %s964_s28 }
 0x802   :  { %v390_v5 = vpop.permute.xlu0 %389 }
 0x803   :  { %v398_v6 = vmax.f32 %v354_v45, %v390_v5  ;;  %v462_v5 = vld [vmem:[%s1462_s9 + $0x38] sm:$0xff] }
 0x805   :  { %402 = vst.msk [vmem:[#allocation3 + $0x18] sm:$0xff] %vm150_vm2, %v398_v6  ;;  %445 = vrot.lane.b32.xlu1 %v398_v6, %s964_s28  ;;  %413 = vrot.lane.b32.xlu0 %v398_v6, %s960_s24 }
 0x806   :  { %429 = vrot.lane.b32.xlu2 %v398_v6, %s962_s26 }
 0x80a   :  { %v384_v7 = vpop.permute.xlu0 %383 }
 0x80b   :  { %v395_v8 = vmax.f32 %v351_v48, %v384_v7  ;;  %v456_v7 = vld [vmem:[%s1462_s9 + $0x8] sm:$0xff] }
 0x80c   :  { %v474_v1 = vld [vmem:[#allocation3 + $0x18] sm:$0xff] }
 0x80d   :  { %399 = vst.msk [vmem:[#allocation3] sm:$0xff] %vm150_vm2, %v395_v8  ;;  %439 = vrot.lane.b32.xlu1 %v395_v8, %s964_s28  ;;  %407 = vrot.lane.b32.xlu0 %v395_v8, %s960_s24 }
 0x80e   :  { %423 = vrot.lane.b32.xlu2 %v395_v8, %s962_s26  ;;  %v463_v8 = vld [vmem:[%s1462_s9 + $0x40] sm:$0xff] }
 0x814   :  { %v471_v6 = vld [vmem:[#allocation3] sm:$0xff] }
 0x815   :  { %425 = vrot.lane.b32.xlu1 %v396_v2, %s962_s26  ;;  %570 = vperm.xlu0 %921, %v500_v9   ;;  %v457_v9 = vld [vmem:[%s1462_s9 + $0x10] sm:$0xff] }
 0x816   :  { %409 = vrot.lane.b32.xlu2 %v396_v2, %s960_s24  ;;  %v473_v2 = vld [vmem:[#allocation3 + $0x10] sm:$0xff] }
 0x81d   :  { %411 = vrot.lane.b32.xlu1 %v397_v4, %s960_s24  ;;  %555 = vperm.xlu0 %921, %v497_v10   ;;  %v455_v4 = vld [vmem:[%s1462_s9] sm:$0xff]  ;;  %v464_v10 = vld [vmem:[%s1462_s9 + $0x48] sm:$0xff] }
 0x81e   :  { %575 = vperm.xlu2 %920, %v501_v11   ;;  %v458_v11 = vld [vmem:[%s1462_s9 + $0x18] sm:$0xff] }
 0x825   :  { %580 = vperm.xlu1 %947, %v502_v12   ;;  %540 = vperm.xlu0 %921, %v494_v13   ;;  %v465_v12 = vld [vmem:[%s1462_s9 + $0x50] sm:$0xff]  ;;  %v459_v13 = vld [vmem:[%s1462_s9 + $0x20] sm:$0xff] }
 0x826   :  { %560 = vperm.xlu2 %920, %v498_v14   ;;  %v466_v14 = vld [vmem:[%s1462_s9 + $0x58] sm:$0xff] }
 0x82d   :  { %565 = vperm.xlu1 %947, %v499_v15   ;;  %525 = vperm.xlu0 %921, %v491_v16   ;;  %v460_v15 = vld [vmem:[%s1462_s9 + $0x28] sm:$0xff]  ;;  %v467_v16 = vld [vmem:[%s1462_s9 + $0x60] sm:$0xff] }
 0x82e   :  { %545 = vperm.xlu2 %920, %v495_v17   ;;  %v461_v17 = vld [vmem:[%s1462_s9 + $0x30] sm:$0xff] }
 0x835   :  { %550 = vperm.xlu1 %947, %v496_v18   ;;  %510 = vperm.xlu0 %921, %v488_v19   ;;  %v468_v18 = vld [vmem:[%s1462_s9 + $0x68] sm:$0xff]  ;;  %v469_v19 = vld [vmem:[%s1462_s9 + $0x70] sm:$0xff] }
 0x836   :  { %530 = vperm.xlu2 %920, %v492_v20   ;;  %v470_v20 = vld [vmem:[%s1462_s9 + $0x78] sm:$0xff] }
 0x83d   :  { %535 = vperm.xlu1 %947, %v493_v21   ;;  %703 = vperm.xlu0 %921, %v681_v22  }
 0x83e   :  { %515 = vperm.xlu2 %920, %v489_v23  }
 0x845   :  { %520 = vperm.xlu1 %947, %v490_v24   ;;  %718 = vperm.xlu0 %921, %v684_v25  }
 0x846   :  { %698 = vperm.xlu2 %920, %v680_v26  }
 0x84d   :  { %505 = vperm.xlu1 %947, %v487_v27   ;;  %733 = vperm.xlu0 %921, %v687_v28  }
 0x84e   :  { %713 = vperm.xlu2 %920, %v683_v29  }
 0x855   :  { %708 = vperm.xlu1 %947, %v682_v30   ;;  %748 = vperm.xlu0 %921, %v690_v31  }
 0x856   :  { %728 = vperm.xlu2 %920, %v686_v32  }
 0x857   :  { %v444_v33 = vpop.permute.xlu2 %443 }
 0x858   :  { %453 = vst.msk [vmem:[#allocation3 + $0x70] sm:$0xff] %vm150_vm2, %v444_v33 }
 0x85d   :  { %723 = vperm.xlu1 %947, %v685_v34   ;;  %763 = vperm.xlu0 %921, %v693_v35  }
 0x85e   :  { %743 = vperm.xlu2 %920, %v689_v36  }
 0x85f   :  { %v485_v52 = vld [vmem:[#allocation3 + $0x70] sm:$0xff] }
 0x860   :  { %v430_v37 = vpop.permute.xlu2 %429 }
 0x861   :  { %438 = vst.msk [vmem:[#allocation3 + $0x58] sm:$0xff] %vm150_vm2, %v430_v37 }
 0x865   :  { %738 = vperm.xlu1 %947, %v688_v38  }
 0x866   :  { %758 = vperm.xlu2 %920, %v692_v39  }
 0x867   :  { %v442_v40 = vpop.permute.xlu0 %441 }
 0x868   :  { %452 = vst.msk [vmem:[#allocation3 + $0x68] sm:$0xff] %vm150_vm2, %v442_v40  ;;  %v424_v41 = vpop.permute.xlu2 %423  ;;  %v482_v56 = vld [vmem:[#allocation3 + $0x58] sm:$0xff] }
 0x869   :  { %435 = vst.msk [vmem:[#allocation3 + $0x40] sm:$0xff] %vm150_vm2, %v424_v41 }
 0x86d   :  { %753 = vperm.xlu1 %947, %v691_v42  }
 0x86e   :  { %773 = vperm.xlu2 %920, %v695_v43  }
 0x86f   :  { %v428_v44 = vpop.permute.xlu0 %427  ;;  %v484_v53 = vld [vmem:[#allocation3 + $0x68] sm:$0xff] }
 0x870   :  { %437 = vst.msk [vmem:[#allocation3 + $0x50] sm:$0xff] %vm150_vm2, %v428_v44  ;;  %v410_v45 = vpop.permute.xlu2 %409  ;;  %v479_v60 = vld [vmem:[#allocation3 + $0x40] sm:$0xff] }
 0x871   :  { %420 = vst.msk [vmem:[#allocation3 + $0x28] sm:$0xff] %vm150_vm2, %v410_v45 }
 0x875   :  { %768 = vperm.xlu1 %947, %v694_v46  }
 0x877   :  { %v414_v47 = vpop.permute.xlu0 %413  ;;  %v446_v48 = vpop.permute.xlu1 %445  ;;  %v481_v57 = vld [vmem:[#allocation3 + $0x50] sm:$0xff] }
 0x878   :  { %422 = vst.msk [vmem:[#allocation3 + $0x38] sm:$0xff] %vm150_vm2, %v414_v47  ;;  %v476_v63 = vld [vmem:[#allocation3 + $0x28] sm:$0xff]  ;;  %v576_v31 = vpop.permute.xlu2 %575 }
 0x879   :  { %454 = vst.msk [vmem:[#allocation3 + $0x78] sm:$0xff] %vm150_vm2, %v446_v48 }
 0x87f   :  { %v408_v49 = vpop.permute.xlu0 %407  ;;  %v440_v50 = vpop.permute.xlu1 %439  ;;  %v478_v61 = vld [vmem:[#allocation3 + $0x38] sm:$0xff] }
 0x880   :  { %419 = vst.msk [vmem:[#allocation3 + $0x20] sm:$0xff] %vm150_vm2, %v408_v49  ;;  %v486_v51 = vld [vmem:[#allocation3 + $0x78] sm:$0xff]  ;;  %v561_v37 = vpop.permute.xlu2 %560 }
 0x881   :  { %451 = vst.msk [vmem:[#allocation3 + $0x60] sm:$0xff] %vm150_vm2, %v440_v50  ;;  %583 = vmatpush.msrb.mxu0 %v486_v51  ;;  %867 = vmatpush.msra.mxu2 %v486_v51 }
 0x883   :  { %584 = vmatpush.msrb.mxu0 %v485_v52  ;;  %868 = vmatpush.msra.mxu2 %v485_v52 }
 0x885   :  { %585 = vmatpush.msrb.mxu0 %v484_v53  ;;  %869 = vmatpush.msra.mxu2 %v484_v53 }
 0x887   :  { %v426_v54 = vpop.permute.xlu1 %425  ;;  %v475_v0 = vld [vmem:[#allocation3 + $0x20] sm:$0xff]  ;;  %v571_v34 = vpop.permute.xlu0 %570 }
 0x888   :  { %436 = vst.msk [vmem:[#allocation3 + $0x48] sm:$0xff] %vm150_vm2, %v426_v54  ;;  %v483_v55 = vld [vmem:[#allocation3 + $0x60] sm:$0xff]  ;;  %v546_v46 = vpop.permute.xlu2 %545 }
 0x889   :  { %586 = vmatpush.msrb.mxu0 %v483_v55  ;;  %870 = vmatpush.msra.mxu2 %v483_v55 }
 0x88b   :  { %587 = vmatpush.msrb.mxu0 %v482_v56  ;;  %871 = vmatpush.msra.mxu2 %v482_v56 }
 0x88d   :  { %588 = vmatpush.msrb.mxu0 %v481_v57  ;;  %872 = vmatpush.msra.mxu2 %v481_v57 }
 0x88f   :  { %v412_v58 = vpop.permute.xlu1 %411  ;;  %v480_v59 = vld [vmem:[#allocation3 + $0x48] sm:$0xff]  ;;  %v556_v39 = vpop.permute.xlu0 %555 }
 0x890   :  { %421 = vst.msk [vmem:[#allocation3 + $0x30] sm:$0xff] %vm150_vm2, %v412_v58  ;;  %589 = vmatpush.msrb.mxu0 %v480_v59  ;;  %873 = vmatpush.msra.mxu2 %v480_v59 }
 0x892   :  { %590 = vmatpush.msrb.mxu0 %v479_v60  ;;  %874 = vmatpush.msra.mxu2 %v479_v60  ;;  %v531_v60 = vpop.permute.xlu2 %530 }
 0x894   :  { %591 = vmatpush.msrb.mxu0 %v478_v61  ;;  %875 = vmatpush.msra.mxu2 %v478_v61 }
 0x897   :  { %v477_v62 = vld [vmem:[#allocation3 + $0x30] sm:$0xff]  ;;  %v581_v30 = vpop.permute.xlu1 %580  ;;  %v541_v50 = vpop.permute.xlu0 %540 }
 0x898   :  { %592 = vmatpush.msrb.mxu0 %v477_v62  ;;  %876 = vmatpush.msra.mxu2 %v477_v62 }
 0x89a   :  { %593 = vmatpush.msrb.mxu0 %v476_v63  ;;  %877 = vmatpush.msra.mxu2 %v476_v63 }
 0x89c   :  { %594 = vmatpush.msrb.mxu0 %v475_v0  ;;  %878 = vmatpush.msra.mxu2 %v475_v0 }
 0x89e   :  { %595 = vmatpush.msrb.mxu0 %v474_v1  ;;  %879 = vmatpush.msra.mxu2 %v474_v1 }
 0x89f   :  { %v566_v35 = vpop.permute.xlu1 %565  ;;  %v526_v0 = vpop.permute.xlu0 %525 }
 0x8a0   :  { %596 = vmatpush.msrb.mxu0 %v473_v2  ;;  %880 = vmatpush.msra.mxu2 %v473_v2 }
 0x8a2   :  { %597 = vmatpush.msrb.mxu0 %v472_v3  ;;  %881 = vmatpush.msra.mxu2 %v472_v3 }
 0x8a4   :  { %598 = vmatpush.msrb.mxu0 %v471_v6  ;;  %882 = vmatpush.msra.mxu2 %v471_v6 }
 0x8a5   :  { %599 = vmatmul.f32.vlgmr.msrb.gmra.mxu0 %v455_v4  ;;  %620 = vmatmul.f32.vlgmr.msra.gmra.mxu2 %v462_v5 }
 0x8a7   :  { %v551_v40 = vpop.permute.xlu1 %550 }
 0x8ad   :  { %602 = vmatmul.f32.gmra.mxu0 %v456_v7  ;;  %623 = vmatmul.f32.gmra.mxu2 %v463_v8 }
 0x8af   :  { %v536_v53 = vpop.permute.xlu1 %535 }
 0x8b5   :  { %605 = vmatmul.f32.gmra.mxu0 %v457_v9  ;;  %626 = vmatmul.f32.gmra.mxu2 %v464_v10  ;;  %v516_v10 = vpop.permute.xlu2 %515 }
 0x8b7   :  { %v521_v3 = vpop.permute.xlu1 %520 }
 0x8bd   :  { %608 = vmatmul.f32.gmra.mxu0 %v458_v11  ;;  %629 = vmatmul.f32.gmra.mxu2 %v465_v12 }
 0x8c5   :  { %611 = vmatmul.f32.gmra.mxu0 %v459_v13  ;;  %632 = vmatmul.f32.gmra.mxu2 %v466_v14  ;;  %v511_v13 = vpop.permute.xlu0 %510 }
 0x8cd   :  { %614 = vmatmul.f32.gmra.mxu0 %v460_v15  ;;  %635 = vmatmul.f32.gmra.mxu2 %v467_v16  ;;  %v506_v16 = vpop.permute.xlu1 %505 }
 0x8d5   :  { %617 = vmatmul.f32.gmra.mxu0 %v461_v17  ;;  %638 = vmatmul.f32.gmra.mxu2 %v468_v18 }
 0x8dd   :  { %641 = vmatmul.f32.gmra.mxu2 %v469_v19 }
 0x8e5   :  { %644 = vmatmul.f32.gmra.mxu2 %v470_v20 }
 0x922   :  { %v1330_v24 = vpop.f32.mrf.mxu0 }
 0x923   :  { %v601_v17 = vadd.f32 %v1330_v24, %v506_v16  ;;  %v672_v24 = vld [vmem:[%s1463_s11 + $0x40] sm:$0xff] }
 0x925   :  { %v648_v20 = vmax.f32 %v601_v17, 0.0 }
 0x928   :  { %v621_v21 = vpop.f32.mrf.mxu2 }
 0x929   :  { %v622_v62 = vadd.f32 %v621_v21, %v541_v50  ;;  %v664_v21 = vld [vmem:[%s1463_s11] sm:$0xff] }
 0x92a   :  { %v1332_v26 = vpop.f32.mrf.mxu0 }
 0x92b   :  { %v655_v4 = vmax.f32 %v622_v62, 0.0  ;;  %v604_v14 = vadd.f32 %v1332_v26, %v511_v13  ;;  %v673_v26 = vld [vmem:[%s1463_s11 + $0x48] sm:$0xff] }
 0x92d   :  { %v649_v19 = vmax.f32 %v604_v14, 0.0 }
 0x930   :  { %v624_v22 = vpop.f32.mrf.mxu2 }
 0x931   :  { %v625_v58 = vadd.f32 %v624_v22, %v546_v46  ;;  %v671_v22 = vld [vmem:[%s1463_s11 + $0x38] sm:$0xff] }
 0x932   :  { %v1334_v28 = vpop.f32.mrf.mxu0 }
 0x933   :  { %v656_v1 = vmax.f32 %v625_v58, 0.0  ;;  %v607_v11 = vadd.f32 %v1334_v28, %v516_v10  ;;  %v674_v28 = vld [vmem:[%s1463_s11 + $0x50] sm:$0xff] }
 0x935   :  { %v650_v18 = vmax.f32 %v607_v11, 0.0 }
 0x938   :  { %v627_v23 = vpop.f32.mrf.mxu2 }
 0x939   :  { %v628_v56 = vadd.f32 %v627_v23, %v551_v40  ;;  %v665_v23 = vld [vmem:[%s1463_s11 + $0x8] sm:$0xff] }
 0x93a   :  { %v609_v32 = vpop.f32.mrf.mxu0 }
 0x93b   :  { %v657_v63 = vmax.f32 %v628_v56, 0.0  ;;  %v610_v8 = vadd.f32 %v609_v32, %v521_v3  ;;  %v676_v32 = vld [vmem:[%s1463_s11 + $0x60] sm:$0xff] }
 0x93d   :  { %v651_v15 = vmax.f32 %v610_v8, 0.0 }
 0x940   :  { %v630_v25 = vpop.f32.mrf.mxu2 }
 0x941   :  { %v631_v54 = vadd.f32 %v630_v25, %v556_v39  ;;  %v666_v25 = vld [vmem:[%s1463_s11 + $0x10] sm:$0xff]  ;;  %v709_v39 = vpop.permute.xlu1 %708 }
 0x942   :  { %v612_v38 = vpop.f32.mrf.mxu0 }
 0x943   :  { %v658_v59 = vmax.f32 %v631_v54, 0.0  ;;  %v613_v6 = vadd.f32 %v612_v38, %v526_v0  ;;  %v699_v38 = vpop.permute.xlu2 %698 }
 0x945   :  { %v652_v12 = vmax.f32 %v613_v6, 0.0 }
 0x948   :  { %v633_v27 = vpop.f32.mrf.mxu2 }
 0x949   :  { %v634_v51 = vadd.f32 %v633_v27, %v561_v37  ;;  %v667_v27 = vld [vmem:[%s1463_s11 + $0x18] sm:$0xff]  ;;  %v704_v37 = vpop.permute.xlu0 %703 }
 0x94a   :  { %v615_v47 = vpop.f32.mrf.mxu0 }
 0x94b   :  { %v659_v57 = vmax.f32 %v634_v51, 0.0  ;;  %v616_v5 = vadd.f32 %v615_v47, %v531_v60 }
 0x94d   :  { %v653_v9 = vmax.f32 %v616_v5, 0.0 }
 0x950   :  { %v636_v29 = vpop.f32.mrf.mxu2 }
 0x951   :  { %v637_v48 = vadd.f32 %v636_v29, %v566_v35  ;;  %v668_v29 = vld [vmem:[%s1463_s11 + $0x20] sm:$0xff]  ;;  %v678_v35 = vld [vmem:[%s1463_s11 + $0x70] sm:$0xff]  ;;  %v719_v40 = vpop.permute.xlu0 %718 }
 0x952   :  { %v618_v61 = vpop.f32.mrf.mxu0 }
 0x953   :  { %v660_v55 = vmax.f32 %v637_v48, 0.0  ;;  %v619_v2 = vadd.f32 %v618_v61, %v536_v53 }
 0x955   :  { %v654_v7 = vmax.f32 %v619_v2, 0.0 }
 0x958   :  { %v639_v33 = vpop.f32.mrf.mxu2 }
 0x959   :  { %v640_v44 = vadd.f32 %v639_v33, %v571_v34  ;;  %v670_v33 = vld [vmem:[%s1463_s11 + $0x30] sm:$0xff]  ;;  %v677_v34 = vld [vmem:[%s1463_s11 + $0x68] sm:$0xff] }
 0x95b   :  { %v661_v52 = vmax.f32 %v640_v44, 0.0  ;;  %v724_v44 = vpop.permute.xlu1 %723 }
 0x960   :  { %v642_v36 = vpop.f32.mrf.mxu2 }
 0x961   :  { %v643_v42 = vadd.f32 %v642_v36, %v576_v31  ;;  %v669_v31 = vld [vmem:[%s1463_s11 + $0x28] sm:$0xff]  ;;  %v679_v36 = vld [vmem:[%s1463_s11 + $0x78] sm:$0xff] }
 0x963   :  { %v662_v49 = vmax.f32 %v643_v42, 0.0  ;;  %v739_v51 = vpop.permute.xlu1 %738 }
 0x968   :  { %v645_v41 = vpop.f32.mrf.mxu2 }
 0x969   :  { %v646_v43 = vadd.f32 %v645_v41, %v581_v30  ;;  %v675_v30 = vld [vmem:[%s1463_s11 + $0x58] sm:$0xff] }
 0x96b   :  { %v663_v45 = vmax.f32 %v646_v43, 0.0  ;;  %v714_v43 = vpop.permute.xlu2 %713  ;;  %v754_v2 = vpop.permute.xlu1 %753 }
 0x96d   :  { %776 = vmatpush.msrb.mxu1 %v663_v45  ;;  %883 = vmatpush.msra.mxu3 %v663_v45  ;;  %v734_v45 = vpop.permute.xlu0 %733 }
 0x96f   :  { %777 = vmatpush.msrb.mxu1 %v662_v49  ;;  %884 = vmatpush.msra.mxu3 %v662_v49 }
 0x971   :  { %778 = vmatpush.msrb.mxu1 %v661_v52  ;;  %885 = vmatpush.msra.mxu3 %v661_v52 }
 0x973   :  { %779 = vmatpush.msrb.mxu1 %v660_v55  ;;  %886 = vmatpush.msra.mxu3 %v660_v55  ;;  %v729_v50 = vpop.permute.xlu2 %728 }
 0x975   :  { %780 = vmatpush.msrb.mxu1 %v659_v57  ;;  %887 = vmatpush.msra.mxu3 %v659_v57  ;;  %v749_v61 = vpop.permute.xlu0 %748 }
 0x977   :  { %781 = vmatpush.msrb.mxu1 %v658_v59  ;;  %888 = vmatpush.msra.mxu3 %v658_v59 }
 0x979   :  { %782 = vmatpush.msrb.mxu1 %v657_v63  ;;  %889 = vmatpush.msra.mxu3 %v657_v63 }
 0x97b   :  { %783 = vmatpush.msrb.mxu1 %v656_v1  ;;  %890 = vmatpush.msra.mxu3 %v656_v1  ;;  %v744_v56 = vpop.permute.xlu2 %743 }
 0x97d   :  { %784 = vmatpush.msrb.mxu1 %v655_v4  ;;  %891 = vmatpush.msra.mxu3 %v655_v4 }
 0x97f   :  { %785 = vmatpush.msrb.mxu1 %v654_v7  ;;  %892 = vmatpush.msra.mxu3 %v654_v7 }
 0x981   :  { %786 = vmatpush.msrb.mxu1 %v653_v9  ;;  %893 = vmatpush.msra.mxu3 %v653_v9 }
 0x983   :  { %787 = vmatpush.msrb.mxu1 %v652_v12  ;;  %894 = vmatpush.msra.mxu3 %v652_v12  ;;  %v759_v7 = vpop.permute.xlu2 %758  ;;  %v764_v12 = vpop.permute.xlu0 %763 }
 0x985   :  { %788 = vmatpush.msrb.mxu1 %v651_v15  ;;  %895 = vmatpush.msra.mxu3 %v651_v15  ;;  %v769_v15 = vpop.permute.xlu1 %768 }
 0x987   :  { %789 = vmatpush.msrb.mxu1 %v650_v18  ;;  %896 = vmatpush.msra.mxu3 %v650_v18 }
 0x989   :  { %790 = vmatpush.msrb.mxu1 %v649_v19  ;;  %897 = vmatpush.msra.mxu3 %v649_v19 }
 0x98b   :  { %791 = vmatpush.msrb.mxu1 %v648_v20  ;;  %898 = vmatpush.msra.mxu3 %v648_v20  ;;  %v774_v18 = vpop.permute.xlu2 %773 }
 0x98c   :  { %792 = vmatmul.f32.vlgmr.msrb.gmra.mxu1 %v664_v21  ;;  %813 = vmatmul.f32.vlgmr.msra.gmra.mxu3 %v671_v22 }
 0x994   :  { %795 = vmatmul.f32.gmra.mxu1 %v665_v23  ;;  %816 = vmatmul.f32.gmra.mxu3 %v672_v24 }
 0x99c   :  { %798 = vmatmul.f32.gmra.mxu1 %v666_v25  ;;  %819 = vmatmul.f32.gmra.mxu3 %v673_v26 }
 0x9a4   :  { %801 = vmatmul.f32.gmra.mxu1 %v667_v27  ;;  %822 = vmatmul.f32.gmra.mxu3 %v674_v28 }
 0x9ac   :  { %804 = vmatmul.f32.gmra.mxu1 %v668_v29  ;;  %825 = vmatmul.f32.gmra.mxu3 %v675_v30 }
 0x9b4   :  { %807 = vmatmul.f32.gmra.mxu1 %v669_v31  ;;  %828 = vmatmul.f32.gmra.mxu3 %v676_v32 }
 0x9bc   :  { %810 = vmatmul.f32.gmra.mxu1 %v670_v33  ;;  %831 = vmatmul.f32.gmra.mxu3 %v677_v34 }
 0x9c4   :  { %834 = vmatmul.f32.gmra.mxu3 %v678_v35 }
 0x9cc   :  { %837 = vmatmul.f32.gmra.mxu3 %v679_v36 }
 0xa09   :  { %v793_v41 = vpop.f32.mrf.mxu1 }
 0xa0a   :  { %v794_v42 = vadd.f32 %v793_v41, %v699_v38 }
 0xa0c   :  { %841 = vst.msk [vmem:[%s1464_s13] sm:$0xff] %vm150_vm2, %v794_v42 }
 0xa0f   :  { %v814_v46 = vpop.f32.mrf.mxu3 }
 0xa10   :  { %v815_v47 = vadd.f32 %v814_v46, %v734_v45 }
 0xa11   :  { %v796_v48 = vpop.f32.mrf.mxu1 }
 0xa12   :  { %848 = vst.msk [vmem:[%s1464_s13 + $0x38] sm:$0xff] %vm150_vm2, %v815_v47  ;;  %v797_v49 = vadd.f32 %v796_v48, %v704_v37 }
 0xa14   :  { %842 = vst.msk [vmem:[%s1464_s13 + $0x8] sm:$0xff] %vm150_vm2, %v797_v49 }
 0xa17   :  { %v817_v52 = vpop.f32.mrf.mxu3 }
 0xa18   :  { %v818_v53 = vadd.f32 %v817_v52, %v739_v51 }
 0xa19   :  { %v799_v54 = vpop.f32.mrf.mxu1 }
 0xa1a   :  { %849 = vst.msk [vmem:[%s1464_s13 + $0x40] sm:$0xff] %vm150_vm2, %v818_v53  ;;  %v800_v55 = vadd.f32 %v799_v54, %v709_v39 }
 0xa1c   :  { %843 = vst.msk [vmem:[%s1464_s13 + $0x10] sm:$0xff] %vm150_vm2, %v800_v55 }
 0xa1f   :  { %v820_v57 = vpop.f32.mrf.mxu3 }
 0xa20   :  { %v821_v58 = vadd.f32 %v820_v57, %v744_v56 }
 0xa21   :  { %v802_v59 = vpop.f32.mrf.mxu1 }
 0xa22   :  { %850 = vst.msk [vmem:[%s1464_s13 + $0x48] sm:$0xff] %vm150_vm2, %v821_v58  ;;  %v803_v60 = vadd.f32 %v802_v59, %v714_v43 }
 0xa24   :  { %844 = vst.msk [vmem:[%s1464_s13 + $0x18] sm:$0xff] %vm150_vm2, %v803_v60 }
 0xa27   :  { %v823_v62 = vpop.f32.mrf.mxu3 }
 0xa28   :  { %v824_v63 = vadd.f32 %v823_v62, %v749_v61 }
 0xa29   :  { %v805_v0 = vpop.f32.mrf.mxu1 }
 0xa2a   :  { %851 = vst.msk [vmem:[%s1464_s13 + $0x50] sm:$0xff] %vm150_vm2, %v824_v63  ;;  %v806_v1 = vadd.f32 %v805_v0, %v719_v40 }
 0xa2c   :  { %845 = vst.msk [vmem:[%s1464_s13 + $0x20] sm:$0xff] %vm150_vm2, %v806_v1 }
 0xa2f   :  { %v826_v3 = vpop.f32.mrf.mxu3 }
 0xa30   :  { %v827_v4 = vadd.f32 %v826_v3, %v754_v2 }
 0xa31   :  { %v808_v5 = vpop.f32.mrf.mxu1 }
 0xa32   :  { %852 = vst.msk [vmem:[%s1464_s13 + $0x58] sm:$0xff] %vm150_vm2, %v827_v4  ;;  %v809_v6 = vadd.f32 %v808_v5, %v724_v44 }
 0xa34   :  { %846 = vst.msk [vmem:[%s1464_s13 + $0x28] sm:$0xff] %vm150_vm2, %v809_v6 }
 0xa37   :  { %v829_v8 = vpop.f32.mrf.mxu3 }
 0xa38   :  { %v830_v9 = vadd.f32 %v829_v8, %v759_v7 }
 0xa39   :  { %v811_v10 = vpop.f32.mrf.mxu1 }
 0xa3a   :  { %853 = vst.msk [vmem:[%s1464_s13 + $0x60] sm:$0xff] %vm150_vm2, %v830_v9  ;;  %v812_v11 = vadd.f32 %v811_v10, %v729_v50 }
 0xa3c   :  { %847 = vst.msk [vmem:[%s1464_s13 + $0x30] sm:$0xff] %vm150_vm2, %v812_v11 }
 0xa3f   :  { %v832_v13 = vpop.f32.mrf.mxu3 }
 0xa40   :  { %v833_v14 = vadd.f32 %v832_v13, %v764_v12 }
 0xa42   :  { %854 = vst.msk [vmem:[%s1464_s13 + $0x68] sm:$0xff] %vm150_vm2, %v833_v14 }
 0xa47   :  { %v835_v16 = vpop.f32.mrf.mxu3 }
 0xa48   :  { %v836_v17 = vadd.f32 %v835_v16, %v769_v15 }
 0xa4a   :  { %855 = vst.msk [vmem:[%s1464_s13 + $0x70] sm:$0xff] %vm150_vm2, %v836_v17 }
 0xa4f   :  { %v838_v19 = vpop.f32.mrf.mxu3 }
 0xa50   :  { %v839_v20 = vadd.f32 %v838_v19, %v774_v18 }
 0xa52   :  { %856 = vst.msk [vmem:[%s1464_s13 + $0x78] sm:$0xff] %vm150_vm2, %v839_v20 }

</bundles_post_ra>
